<compile_context>
chip_gen: v7x
topology: tpu7x:2x2x1
jax: 0.10.0
libtpu: 0.0.40
codegen_flags: <defaults>
</compile_context>

<pallas_src>
import functools
import math

import jax
import jax.numpy as jnp
from jax import lax
from jax.experimental import pallas as pl
from jax.experimental.pallas import tpu as pltpu

_NEG_INF = float(-1e30)   # finite "minus infinity": avoids inf-inf NaN traps


def _round_up(x, m):
    return (x + m - 1) // m * m


def arcface_kernel(emb_ref, w_ref, labels_ref, erinv_ref, wrinv_ref, out_ref,
                   l_sc, tgt_sc, *, cos_m, sin_m, scale, num_classes, tile_c):
    c = pl.program_id(1)
    nc = pl.num_programs(1)

    @pl.when(c == 0)
    def _init():
        l_sc[...] = jnp.zeros_like(l_sc)
        tgt_sc[...] = jnp.zeros_like(tgt_sc)

    # bf16 x bf16 -> f32 on the MXU, contracting the LAST dims of both operands
    # (no in-kernel transpose / relayout of the streamed (TC, D) weight tile).
    raw = lax.dot_general(
        emb_ref[...], w_ref[...],
        dimension_numbers=(((1,), (1,)), ((), ())),
        preferred_element_type=jnp.float32)                       # (TB, TC)

    # Rank-1 post-matmul scaling. erinv already carries the softmax scale s,
    # so `scaled` == s * cosine. Both norm factors were precomputed in f32 in
    # the wrapper (no per-step (TC, D) cast / square / reduce / rsqrt).
    scaled = (raw * erinv_ref[...]) * wrinv_ref[...]              # (TB, TC)

    labels = labels_ref[...]                                      # (TB, 1)
    class_ids = c * tile_c + lax.broadcasted_iota(jnp.int32, scaled.shape, 1)
    is_target = class_ids == labels                               # (TB, TC)

    # Per-row target scaled-cosine (each row's label falls in exactly one tile).
    tgt_scaled = jnp.sum(jnp.where(is_target, scaled, 0.0),
                         axis=1, keepdims=True)                   # (TB, 1)
    row_has_tgt = jnp.logical_and(labels >= c * tile_c,
                                  labels < (c + 1) * tile_c)      # (TB, 1)

    # Margin math only on the (TB,1) target vector:
    # cos(acos(clip(x)) + m) = clip(x)*cos(m) - sqrt(1 - clip(x)^2)*sin(m)
    eps = 1e-6
    cos_t = jnp.clip(tgt_scaled * (1.0 / scale), -1.0 + eps, 1.0 - eps)
    mod_scaled = (cos_t * cos_m - jnp.sqrt(1.0 - cos_t * cos_t) * sin_m) * scale

    # Margin applied with a single vselect (broadcasting the (TB,1) column).
    logits = jnp.where(is_target, mod_scaled, scaled)
    if num_classes % tile_c != 0:
        # Padded classes exist only when C % TC != 0 (trace-time gate).
        logits = jnp.where(class_ids < num_classes, logits, _NEG_INF)

    # Fixed-max flash-CE accumulation: logits <= scale (cosine <= 1), so the
    # online row-max / alpha-rescale is unnecessary; guard the log at finalize.
    l_sc[...] += jnp.sum(jnp.exp(logits - scale), axis=1, keepdims=True)
    tgt_sc[...] += jnp.where(row_has_tgt, mod_scaled, 0.0)

    @pl.when(c == nc - 1)
    def _finalize():
        # per-row loss = logsumexp(logits) - target_logit
        lse = scale + jnp.log(jnp.maximum(l_sc[...], 1e-37))
        out_ref[...] = lse - tgt_sc[...]


def arcface_loss(embeddings, W, labels, *, margin, scale,
                 tile_b=256, tile_c=1024):
    """ArcFace forward loss (mean cross-entropy with angular margin)."""
    B, D = embeddings.shape
    C, D2 = W.shape
    assert D == D2
    assert tile_b % 8 == 0 and tile_c % 128 == 0

    Dp = _round_up(D, 128)                       # lane-aligned contraction dim
    TB = min(tile_b, _round_up(B, 8))
    # v7x has 2 TensorCores: make sure the "parallel" batch axis has >= 2 tiles
    # (shrink TB for small batches rather than running a single batch tile).
    if B > 8 and _round_up(B, TB) // TB < 2:
        TB = _round_up((B + 1) // 2, 8)
    TC = min(tile_c, _round_up(C, 128))
    Bp = _round_up(B, TB)
    Cp = _round_up(C, TC)

    # Norm math hoisted to the wrapper, kept in f32; softmax scale folded into
    # the per-row factor. Padded W rows get w_rinv == 0.
    emb_f32 = embeddings.astype(jnp.float32)
    w_f32 = W.astype(jnp.float32)
    erinv_s = scale * lax.rsqrt(
        jnp.maximum(jnp.sum(emb_f32 * emb_f32, axis=1, keepdims=True), 1e-24))
    wrinv = lax.rsqrt(
        jnp.maximum(jnp.sum(w_f32 * w_f32, axis=1), 1e-24)).reshape(1, C)

    # bf16 operands for the MXU / halved HBM traffic on the dominant W stream.
    emb_p = jnp.pad(embeddings.astype(jnp.bfloat16), ((0, Bp - B), (0, Dp - D)))
    w_p = jnp.pad(W.astype(jnp.bfloat16), ((0, Cp - C), (0, Dp - D)))
    labels_p = jnp.pad(labels.astype(jnp.int32), (0, Bp - B)).reshape(Bp, 1)
    erinv_p = jnp.pad(erinv_s, ((0, Bp - B), (0, 0)))
    wrinv_p = jnp.pad(wrinv, ((0, 0), (0, Cp - C)))

    kernel = functools.partial(
        arcface_kernel,
        cos_m=float(math.cos(margin)),
        sin_m=float(math.sin(margin)),
        scale=float(scale),
        num_classes=C,
        tile_c=TC,
    )

    # Explicit VMEM budget: double-buffered bf16 operand tiles + headroom for
    # the in-flight (TB, TC) f32 temporaries (v7x-safe: stays well under 64 MiB).
    operand_bytes = 2 * (TB * Dp + TC * Dp) * 2
    temp_bytes = 12 * TB * TC * 4
    vmem_limit = int(min(operand_bytes + temp_bytes + (2 << 20), 56 << 20))
    vmem_limit = max(vmem_limit, 8 << 20)

    row_losses = pl.pallas_call(
        kernel,
        out_shape=jax.ShapeDtypeStruct((Bp, 1), jnp.float32),
        grid_spec=pltpu.PrefetchScalarGridSpec(
            num_scalar_prefetch=0,
            grid=(Bp // TB, Cp // TC),
            in_specs=[
                pl.BlockSpec((TB, Dp), lambda i, c: (i, 0)),  # embeddings bf16
                pl.BlockSpec((TC, Dp), lambda i, c: (c, 0)),  # W bf16 (streamed)
                pl.BlockSpec((TB, 1), lambda i, c: (i, 0)),   # labels
                pl.BlockSpec((TB, 1), lambda i, c: (i, 0)),   # scale / ||e||
                pl.BlockSpec((1, TC), lambda i, c: (0, c)),   # 1 / ||w||
            ],
            out_specs=pl.BlockSpec((TB, 1), lambda i, c: (i, 0)),
            scratch_shapes=[pltpu.VMEM((TB, 1), jnp.float32)] * 2,
        ),
        compiler_params=pltpu.CompilerParams(
            dimension_semantics=("parallel", "arbitrary"),
            vmem_limit_bytes=vmem_limit),
    )(emb_p, w_p, labels_p, erinv_p, wrinv_p)

    # Tiny final mean over the real B rows done in the wrapper so the batch
    # grid axis can remain "parallel".
    return jnp.mean(row_losses[:B, 0])


def arcface_loss_ref(embeddings, W, labels, *, margin, scale):
    """Pure-JAX f32 reference mirroring the PyTorch module (for validation)."""
    emb_n = embeddings / jnp.maximum(
        jnp.linalg.norm(embeddings, axis=1, keepdims=True), 1e-12)
    w_n = W / jnp.maximum(jnp.linalg.norm(W, axis=1, keepdims=True), 1e-12)
    cosine = emb_n @ w_n.T
    mask = jax.nn.one_hot(labels, W.shape[0], dtype=jnp.float32)
    cot = jnp.sum(cosine * mask, axis=1, keepdims=True)
    eps = 1e-6
    modified = jnp.cos(jnp.arccos(jnp.clip(cot, -1 + eps, 1 - eps)) + margin)
    logits = (cosine + mask * (modified - cot)) * scale
    logp = jax.nn.log_softmax(logits, axis=1)
    return -jnp.mean(jnp.sum(logp * mask, axis=1))


if __name__ == "__main__":
    margin = 0.5
    scale = 64.0
    keys = jax.random.split(jax.random.PRNGKey(0), 6)

    # --- Test 1: small shapes implied by the module --------------------------
    batch, embedding_dim, num_classes = 8, 32, 16
    embeddings = jax.random.normal(keys[0], (batch, embedding_dim), jnp.float32)
    # nn.init.xavier_normal_: std = sqrt(2 / (fan_in + fan_out))
    xavier_std = math.sqrt(2.0 / (num_classes + embedding_dim))
    W = xavier_std * jax.random.normal(keys[1], (num_classes, embedding_dim),
                                       jnp.float32)
    labels = jax.random.randint(keys[2], (batch,), 0, num_classes, jnp.int32)

    loss = jax.block_until_ready(
        arcface_loss(embeddings, W, labels, margin=margin, scale=scale))
    loss_ref = arcface_loss_ref(embeddings, W, labels,
                                margin=margin, scale=scale)
    # bf16 MXU operands -> compare at bf16-appropriate tolerance.
    assert jnp.allclose(loss, loss_ref, rtol=2e-2, atol=1e-1), (loss, loss_ref)

    # --- Test 2: exercises the (batch, class) grid, streaming and padding ----
    batch2, dim2, classes2 = 50, 128, 1000
    emb2 = jax.random.normal(keys[3], (batch2, dim2), jnp.float32)
    w2 = math.sqrt(2.0 / (classes2 + dim2)) * jax.random.normal(
        keys[4], (classes2, dim2), jnp.float32)
    lab2 = jax.random.randint(keys[5], (batch2,), 0, classes2, jnp.int32)

    loss2 = jax.block_until_ready(
        arcface_loss(emb2, w2, lab2, margin=margin, scale=scale))
    loss2_ref = arcface_loss_ref(emb2, w2, lab2, margin=margin, scale=scale)
    assert jnp.allclose(loss2, loss2_ref, rtol=2e-2, atol=1e-1), (loss2,
                                                                  loss2_ref)

    print("KERNEL_OK")
</pallas_src>

<mosaic_0001>
module attributes {stable_mosaic.version = 11 : i64} {
  func.func @arcface_kernel(%arg0: i32, %arg1: i32, %arg2: memref<8x128xbf16, #tpu.memory_space<vmem>>, %arg3: memref<128x128xbf16, #tpu.memory_space<vmem>>, %arg4: memref<8x1xi32, #tpu.memory_space<vmem>>, %arg5: memref<8x1xf32, #tpu.memory_space<vmem>>, %arg6: memref<1x128xf32, #tpu.memory_space<vmem>>, %arg7: memref<8x1xf32, #tpu.memory_space<vmem>>, %arg8: memref<8x1xf32, #tpu.memory_space<vmem>>, %arg9: memref<8x1xf32, #tpu.memory_space<vmem>>) attributes {dimension_semantics = [#tpu.dimension_semantics<parallel>, #tpu.dimension_semantics<arbitrary>], iteration_bounds = array<i64: 1, 1>, scalar_prefetch = 0 : i64, scratch_operands = 2 : i64, tpu.core_type = #tpu.core_type<tc>, window_params = [{transform_indices = @transform_0, window_bounds = array<i64: 8, 128>}, {transform_indices = @transform_1, window_bounds = array<i64: 128, 128>}, {transform_indices = @transform_2, window_bounds = array<i64: 8, 1>}, {transform_indices = @transform_3, window_bounds = array<i64: 8, 1>}, {transform_indices = @transform_4, window_bounds = array<i64: 1, 128>}, {transform_indices = @transform_5, window_bounds = array<i64: 8, 1>}]} {
    %c0_i32 = arith.constant 0 : i32
    %0 = arith.cmpi eq, %arg1, %c0_i32 : i32
    %1 = arith.extui %0 : i1 to i32
    %c0_i32_0 = arith.constant 0 : i32
    %2 = arith.cmpi ne, %1, %c0_i32_0 : i32
    scf.if %2 {
      %cst_35 = arith.constant 0.000000e+00 : f32
      %71 = vector.broadcast %cst_35 : f32 to vector<8x1xf32>
      %c0_36 = arith.constant 0 : index
      %c0_37 = arith.constant 0 : index
      %72 = vector.load %arg8[%c0_36, %c0_37] : memref<8x1xf32, #tpu.memory_space<vmem>>, vector<8x1xf32>
      tpu.vector_store %arg8[%c0_36, %c0_37], %71 {strides = array<i32>} : memref<8x1xf32, #tpu.memory_space<vmem>>, vector<8x1xf32>,
      %cst_38 = arith.constant 0.000000e+00 : f32
      %73 = vector.broadcast %cst_38 : f32 to vector<8x1xf32>
      %c0_39 = arith.constant 0 : index
      %c0_40 = arith.constant 0 : index
      %74 = vector.load %arg9[%c0_39, %c0_40] : memref<8x1xf32, #tpu.memory_space<vmem>>, vector<8x1xf32>
      tpu.vector_store %arg9[%c0_39, %c0_40], %73 {strides = array<i32>} : memref<8x1xf32, #tpu.memory_space<vmem>>, vector<8x1xf32>,
    } else {
    }
    %c0 = arith.constant 0 : index
    %c0_1 = arith.constant 0 : index
    %3 = vector.load %arg2[%c0, %c0_1] : memref<8x128xbf16, #tpu.memory_space<vmem>>, vector<8x128xbf16>
    %c0_2 = arith.constant 0 : index
    %c0_3 = arith.constant 0 : index
    %4 = vector.load %arg3[%c0_2, %c0_3] : memref<128x128xbf16, #tpu.memory_space<vmem>>, vector<128x128xbf16>
    %cst = arith.constant dense<0.000000e+00> : vector<8x128xf32>
    %5 = tpu.matmul %3, %4, %cst {dimension_numbers = #tpu.dot_dimension_numbers<[1], [1], [0], [0], [0, 0, 1, 0], [], []>} : vector<8x128xbf16>, vector<128x128xbf16>, vector<8x128xf32> -> vector<8x128xf32>
    %c0_4 = arith.constant 0 : index
    %c0_5 = arith.constant 0 : index
    %6 = vector.load %arg5[%c0_4, %c0_5] : memref<8x1xf32, #tpu.memory_space<vmem>>, vector<8x1xf32>
    %7 = vector.broadcast %6 : vector<8x1xf32> to vector<8x128xf32>
    %8 = arith.mulf %5, %7 : vector<8x128xf32>
    %c0_6 = arith.constant 0 : index
    %c0_7 = arith.constant 0 : index
    %9 = vector.load %arg6[%c0_6, %c0_7] : memref<1x128xf32, #tpu.memory_space<vmem>>, vector<1x128xf32>
    %10 = vector.broadcast %9 : vector<1x128xf32> to vector<8x128xf32>
    %11 = arith.mulf %8, %10 : vector<8x128xf32>
    %c0_8 = arith.constant 0 : index
    %c0_9 = arith.constant 0 : index
    %12 = vector.load %arg4[%c0_8, %c0_9] : memref<8x1xi32, #tpu.memory_space<vmem>>, vector<8x1xi32>
    %c128_i32 = arith.constant 128 : i32
    %13 = arith.muli %arg1, %c128_i32 : i32
    %14 = tpu.iota {dimensions = array<i32: 1>} : vector<8x128xi32>
    %15 = vector.broadcast %13 : i32 to vector<8x128xi32>
    %16 = arith.addi %15, %14 : vector<8x128xi32>
    %17 = vector.broadcast %12 : vector<8x1xi32> to vector<8x128xi32>
    %18 = arith.cmpi eq, %16, %17 : vector<8x128xi32>
    %cst_10 = arith.constant 0.000000e+00 : f32
    %19 = vector.broadcast %cst_10 : f32 to vector<8x128xf32>
    %20 = arith.select %18, %11, %19 : vector<8x128xi1>, vector<8x128xf32>
    %cst_11 = arith.constant dense<0.000000e+00> : vector<8xf32>
    %21 = vector.multi_reduction <add>, %20, %cst_11 [1] : vector<8x128xf32> to vector<8xf32>
    %22 = vector.shape_cast %21 : vector<8xf32> to vector<8x1xf32>
    %c128_i32_12 = arith.constant 128 : i32
    %23 = arith.muli %arg1, %c128_i32_12 : i32
    %24 = vector.broadcast %23 : i32 to vector<8x1xi32>
    %25 = arith.cmpi sge, %12, %24 : vector<8x1xi32>
    %c1_i32 = arith.constant 1 : i32
    %26 = arith.addi %arg1, %c1_i32 : i32
    %c128_i32_13 = arith.constant 128 : i32
    %27 = arith.muli %26, %c128_i32_13 : i32
    %28 = vector.broadcast %27 : i32 to vector<8x1xi32>
    %29 = arith.cmpi slt, %12, %28 : vector<8x1xi32>
    %30 = arith.andi %25, %29 : vector<8x1xi1>
    %cst_14 = arith.constant 1.562500e-02 : f32
    %31 = vector.broadcast %cst_14 : f32 to vector<8x1xf32>
    %32 = arith.mulf %22, %31 : vector<8x1xf32>
    %cst_15 = arith.constant -0.999998986 : f32
    %cst_16 = arith.constant 0.999998986 : f32
    %33 = vector.broadcast %cst_15 : f32 to vector<8x1xf32>
    %34 = arith.maximumf %33, %32 : vector<8x1xf32>
    %35 = vector.broadcast %cst_16 : f32 to vector<8x1xf32>
    %36 = arith.minimumf %35, %34 : vector<8x1xf32>
    %cst_17 = arith.constant 0.87758255 : f32
    %37 = vector.broadcast %cst_17 : f32 to vector<8x1xf32>
    %38 = arith.mulf %36, %37 : vector<8x1xf32>
    %39 = arith.mulf %36, %36 : vector<8x1xf32>
    %cst_18 = arith.constant 1.000000e+00 : f32
    %40 = vector.broadcast %cst_18 : f32 to vector<8x1xf32>
    %41 = arith.subf %40, %39 : vector<8x1xf32>
    %42 = math.sqrt %41 : vector<8x1xf32>
    %cst_19 = arith.constant 0.47942555 : f32
    %43 = vector.broadcast %cst_19 : f32 to vector<8x1xf32>
    %44 = arith.mulf %42, %43 : vector<8x1xf32>
    %45 = arith.subf %38, %44 : vector<8x1xf32>
    %cst_20 = arith.constant 6.400000e+01 : f32
    %46 = vector.broadcast %cst_20 : f32 to vector<8x1xf32>
    %47 = arith.mulf %45, %46 : vector<8x1xf32>
    %48 = vector.shape_cast %47 : vector<8x1xf32> to vector<8x1xf32>
    %49 = vector.broadcast %48 : vector<8x1xf32> to vector<8x128xf32>
    %50 = arith.select %18, %49, %11 : vector<8x128xi1>, vector<8x128xf32>
    %c16_i32 = arith.constant 16 : i32
    %51 = vector.broadcast %c16_i32 : i32 to vector<8x128xi32>
    %52 = arith.cmpi slt, %16, %51 : vector<8x128xi32>
    %cst_21 = arith.constant -1.000000e+30 : f32
    %53 = vector.broadcast %cst_21 : f32 to vector<8x128xf32>
    %54 = arith.select %52, %50, %53 : vector<8x128xi1>, vector<8x128xf32>
    %c0_22 = arith.constant 0 : index
    %c0_23 = arith.constant 0 : index
    %55 = vector.load %arg8[%c0_22, %c0_23] : memref<8x1xf32, #tpu.memory_space<vmem>>, vector<8x1xf32>
    %cst_24 = arith.constant 6.400000e+01 : f32
    %56 = vector.broadcast %cst_24 : f32 to vector<8x128xf32>
    %57 = arith.subf %54, %56 : vector<8x128xf32>
    %58 = math.exp %57 : vector<8x128xf32>
    %cst_25 = arith.constant dense<0.000000e+00> : vector<8xf32>
    %59 = vector.multi_reduction <add>, %58, %cst_25 [1] : vector<8x128xf32> to vector<8xf32>
    %60 = vector.shape_cast %59 : vector<8xf32> to vector<8x1xf32>
    %61 = arith.addf %55, %60 : vector<8x1xf32>
    %c0_26 = arith.constant 0 : index
    %c0_27 = arith.constant 0 : index
    %62 = vector.load %arg8[%c0_26, %c0_27] : memref<8x1xf32, #tpu.memory_space<vmem>>, vector<8x1xf32>
    tpu.vector_store %arg8[%c0_26, %c0_27], %61 {strides = array<i32>} : memref<8x1xf32, #tpu.memory_space<vmem>>, vector<8x1xf32>,
    %c0_28 = arith.constant 0 : index
    %c0_29 = arith.constant 0 : index
    %63 = vector.load %arg9[%c0_28, %c0_29] : memref<8x1xf32, #tpu.memory_space<vmem>>, vector<8x1xf32>
    %cst_30 = arith.constant 0.000000e+00 : f32
    %64 = vector.broadcast %cst_30 : f32 to vector<8x1xf32>
    %65 = arith.select %30, %47, %64 : vector<8x1xi1>, vector<8x1xf32>
    %66 = arith.addf %63, %65 : vector<8x1xf32>
    %c0_31 = arith.constant 0 : index
    %c0_32 = arith.constant 0 : index
    %67 = vector.load %arg9[%c0_31, %c0_32] : memref<8x1xf32, #tpu.memory_space<vmem>>, vector<8x1xf32>
    tpu.vector_store %arg9[%c0_31, %c0_32], %66 {strides = array<i32>} : memref<8x1xf32, #tpu.memory_space<vmem>>, vector<8x1xf32>,
    %c0_i32_33 = arith.constant 0 : i32
    %68 = arith.cmpi eq, %arg1, %c0_i32_33 : i32
    %69 = arith.extui %68 : i1 to i32
    %c0_i32_34 = arith.constant 0 : i32
    %70 = arith.cmpi ne, %69, %c0_i32_34 : i32
    scf.if %70 {
      %c0_35 = arith.constant 0 : index
      %c0_36 = arith.constant 0 : index
      %71 = vector.load %arg8[%c0_35, %c0_36] : memref<8x1xf32, #tpu.memory_space<vmem>>, vector<8x1xf32>
      %cst_37 = arith.constant 9.99999991E-38 : f32
      %72 = vector.broadcast %cst_37 : f32 to vector<8x1xf32>
      %73 = arith.maximumf %71, %72 : vector<8x1xf32>
      %74 = math.log %73 : vector<8x1xf32>
      %cst_38 = arith.constant 6.400000e+01 : f32
      %75 = vector.broadcast %cst_38 : f32 to vector<8x1xf32>
      %76 = arith.addf %75, %74 : vector<8x1xf32>
      %c0_39 = arith.constant 0 : index
      %c0_40 = arith.constant 0 : index
      %77 = vector.load %arg9[%c0_39, %c0_40] : memref<8x1xf32, #tpu.memory_space<vmem>>, vector<8x1xf32>
      %78 = arith.subf %76, %77 : vector<8x1xf32>
      %c0_41 = arith.constant 0 : index
      %c0_42 = arith.constant 0 : index
      %79 = vector.load %arg7[%c0_41, %c0_42] : memref<8x1xf32, #tpu.memory_space<vmem>>, vector<8x1xf32>
      tpu.vector_store %arg7[%c0_41, %c0_42], %78 {strides = array<i32>} : memref<8x1xf32, #tpu.memory_space<vmem>>, vector<8x1xf32>,
    } else {
    }
    return
  }
  func.func @transform_0(%arg0: i32, %arg1: i32) -> (i32, i32) {
    %c0_i32 = arith.constant 0 : i32
    %c0_i32_0 = arith.constant 0 : i32
    return %arg0, %c0_i32 : i32, i32
  }
  func.func @transform_1(%arg0: i32, %arg1: i32) -> (i32, i32) {
    %c0_i32 = arith.constant 0 : i32
    %c0_i32_0 = arith.constant 0 : i32
    return %arg1, %c0_i32 : i32, i32
  }
  func.func @transform_2(%arg0: i32, %arg1: i32) -> (i32, i32) {
    %c0_i32 = arith.constant 0 : i32
    %c0_i32_0 = arith.constant 0 : i32
    return %arg0, %c0_i32 : i32, i32
  }
  func.func @transform_3(%arg0: i32, %arg1: i32) -> (i32, i32) {
    %c0_i32 = arith.constant 0 : i32
    %c0_i32_0 = arith.constant 0 : i32
    return %arg0, %c0_i32 : i32, i32
  }
  func.func @transform_4(%arg0: i32, %arg1: i32) -> (i32, i32) {
    %c0_i32 = arith.constant 0 : i32
    %c0_i32_0 = arith.constant 0 : i32
    return %c0_i32, %arg1 : i32, i32
  }
  func.func @transform_5(%arg0: i32, %arg1: i32) -> (i32, i32) {
    %c0_i32 = arith.constant 0 : i32
    %c0_i32_0 = arith.constant 0 : i32
    return %arg0, %c0_i32 : i32, i32
  }
}

</mosaic_0001>

<bundles_post_ra>
// kernel: tpu_custom_call.1
= control target key start
LH: loop header
LB: loop body
LE: loop exit
PB: predicated region body
PF: predicated region fallthrough
CT: control target
= control target key end

     0   :  { %10 = vsyncpa [#allocation5], 0  ;;  %s314_s18 = smov [#allocation4]   ;;  %s384_s0 = inlined_call_operand.vmem [shape: bf16[8,128], index: 0, kind: input, shape index: {}]   ;;  %s385_s1 = inlined_call_operand.hbm [shape: bf16[128,128], index: 1, kind: input, shape index: {}]   ;;  %s386_s2 = inlined_call_operand.vmem [shape: s32[8,1], index: 2, kind: input, shape index: {}]   ;;  %s387_s3 = inlined_call_operand.vmem [shape: f32[8,1], index: 3, kind: input, shape index: {}]   ;;  %s388_s4 = inlined_call_operand.vmem [shape: f32[1,128], index: 4, kind: input, shape index: {}]   ;;  %s389_s5 = inlined_call_operand.vmem [shape: f32[8,1], index: 5, kind: output, shape index: {}]  }
   0x1   :  { %s18_s19 = sshll.u32 %s314_s18, 4  ;;  %s290_s22 = scalar_lea.hbm %s385_s1, 1024  ;;  %s19_s19 = int_to_ptr.vmem [resolvable:$true] %s18_s19 }
   0x2   :  { %p291_p0 = scmp.ne.s32.totalorder %s385_s1, %s290_s22  ;;  %p294_p1 = scmp.lt.u32.totalorder %s290_s22, %s385_s1 }
   0x4   :  { %p296_p2 = pnand %p294_p1, %p291_p0 }
   0x6   :  { %299 = shalt.err (!%p296_p2)
}
   0x7   :  { %s300_s27 = scalar_lea.vmem %s19_s19, 1024  ;;  %p305_p4 = scmp.lt.s32.totalorder %s19_s19, %s19_s19 }
   0x8   :  { %p301_p3 = scmp.ne.s32.totalorder %s19_s19, %s300_s27  ;;  %p306_p5 = scmp.lt.s32.totalorder %s300_s27, %s300_s27 }
   0xa   :  { %p307_p6 = por %p306_p5, %p305_p4 }
   0xc   :  { %p308_p7 = pnand %p307_p6, %p301_p3 }
   0xe   :  { %311 = shalt.err (!%p308_p7)
}
   0xf   :  { %s315_s28 = smov 64   ;;  %s316_s29 = smov 4  }
  0x10   :  { %24 = dma.hbm_to_vmem [thread:$0]  %s385_s1, 1024, %s19_s19, [#allocation5], %s315_s28, %s315_s28, %s316_s29  }
  0x11   :  { %312 = dma.done.wait [#allocation5], 1024  }
  0x12   :  { %313 = vsyncadd [#allocation5], 4294966272  ;;  %v317_v0 = vmov 0.0   ;;  %vm318_vm0 = vmmov 0   ;;  %v319_v1 = vmov 0   ;;  %v276_v2 = vld [vmem:[#allocation4] sm:$0xff]   ;;  %v164_v14 = vlaneseq }
  0x13   :  { %249 = vmatprep.subr.bf16.mxu0 %v317_v0  ;;  %265 = vmatprep.mubr.msk.bf16.mxu0 %vm318_vm0, %v317_v0  ;;  %v277_v3 = vld [vmem:[#allocation4 + $0x8] sm:$0xff]   ;;  %v147_v4 = vld [vmem:[%s387_s3] sm:$0xff]  ;;  %v279_v7 = vld [vmem:[#allocation4 + $0x18] sm:$0xff]   ;;  %vm39_vm1 = vcmask 7168  }
  0x14   :  { %275 = vset.pattern.permute.xlu0 %v319_v1  ;;  %250 = vmatpush3.bf16.xpose.msra.mxu0 %v276_v2  ;;  %v162_v5 = vld [vmem:[%s386_s2] sm:$0xff]  ;;  %v280_v8 = vld [vmem:[#allocation4 + $0x20] sm:$0xff]   ;;  %v281_v9 = vld [vmem:[#allocation4 + $0x28] sm:$0xff]   ;;  %41 = vst.msk [vmem:[#allocation3] sm:$0xff] %vm39_vm1, %v317_v0  ;;  %v165_v15 = vand.u32 127, %v164_v14 }
  0x15   :  { %251 = vmatprep.subr.bf16.mxu0 %v317_v0  ;;  %150 = vperm.xlu0 %275, %v147_v4   ;;  %v278_v6 = vld [vmem:[#allocation4 + $0x10] sm:$0xff]   ;;  %v283_v11 = vld [vmem:[#allocation4 + $0x38] sm:$0xff]   ;;  %40 = vst.msk [vmem:[#allocation2] sm:$0xff] %vm39_vm1, %v317_v0  ;;  %vm175_vm5 = vcmp.ge.s32.totalorder %v162_v5, 0  ;;  %vm179_vm6 = vcmp.lt.s32.totalorder %v162_v5, 128 }
  0x16   :  { %v282_v10 = vld [vmem:[#allocation4 + $0x30] sm:$0xff]   ;;  %vm180_vm7 = vmand %vm175_vm5, %vm179_vm6  ;;  %vm198_vm8 = vcmp.lt.s32.totalorder %v165_v15, 16 }
  0x17   :  { %v42_v12 = vld [vmem:[%s384_s0] sm:$0xf] }
  0x18   :  { %v237_v17 = vld [vmem:[%s388_s4] ss:$0 sm:$0xff] }
  0x19   :  { %169 = vperm.xlu0 %275, %v162_v5  }
  0x1b   :  { %v209_v39 = vld [vmem:[#allocation3] sm:$0xff] }
  0x1c   :  { %252 = vmatpush3.bf16.xpose.msra.mxu0 %v277_v3  ;;  %v200_v47 = vld [vmem:[#allocation2] sm:$0xff] }
  0x1d   :  { %253 = vmatprep.subr.bf16.mxu0 %v317_v0 }
  0x24   :  { %254 = vmatpush3.bf16.xpose.msra.mxu0 %v278_v6 }
  0x25   :  { %255 = vmatprep.subr.bf16.mxu0 %v317_v0 }
  0x2c   :  { %256 = vmatpush3.bf16.xpose.msra.mxu0 %v279_v7 }
  0x2d   :  { %257 = vmatprep.subr.bf16.mxu0 %v317_v0 }
  0x34   :  { %258 = vmatpush3.bf16.xpose.msra.mxu0 %v280_v8 }
  0x35   :  { %259 = vmatprep.subr.bf16.mxu0 %v317_v0 }
  0x3c   :  { %260 = vmatpush3.bf16.xpose.msra.mxu0 %v281_v9 }
  0x3d   :  { %261 = vmatprep.subr.bf16.mxu0 %v317_v0 }
  0x44   :  { %262 = vmatpush3.bf16.xpose.msra.mxu0 %v282_v10 }
  0x45   :  { %263 = vmatprep.subr.bf16.mxu0 %v317_v0 }
  0x4c   :  { %264 = vmatpush3.bf16.xpose.msra.mxu0 %v283_v11 }
  0x53   :  { %266 = vmatmul.mubr.bf16.vlgmr.msra.gmra.mrb[0].mxu0 %v42_v12 }
  0x94   :  { %v151_v13 = vpop.permute.xlu0 %150 }
  0x98   :  { %v170_v18 = vpop.permute.xlu0 %169 }
  0x99   :  { %vm171_vm2 = vcmp.eq.s32.totalorder %v165_v15, %v170_v18 }
 0x126   :  { %v141_v16 = vpop.f32.mrb[0].mxu0 }
 0x127   :  { %v153_v19 = vmul.f32 %v151_v13, %v141_v16  ;;  %v267_v20 = vpop.f32.mrb[1].mxu0 }
 0x128   :  { %v144_v21 = vpop.f32.mrb[2].mxu0 }
 0x129   :  { %v268_v22 = vpop.f32.mrb[3].mxu0  ;;  %v161_v23 = vmul.f32 %v237_v17, %v153_v19 }
 0x12b   :  { %v172_v24 = vsel %vm171_vm2, %v161_v23, 0.0 }
 0x12c   :  { %173 = vadd.xlane.f32.xlu1 %v172_v24 }
 0x1b9   :  { %v174_v25 = vpop.xlane.xlu1 %173 }
 0x1ba   :  { %v181_v26 = vmul.f32 0.015625, %v174_v25 }
 0x1bc   :  { %v238_v27 = vclamps-f32 %v181_v26, 0.999999 }
 0x1be   :  { %v185_v28 = vmul.f32 %v238_v27, %v238_v27  ;;  %v184_v35 = vmul.f32 0.87758255, %v238_v27 }
 0x1c0   :  { %v186_v29 = vsub.f32 1.0, %v185_v28 }
 0x1c2   :  { %284 = vrsqrt.f32 %v186_v29  ;;  %vm189_vm3 = vcmp.eq.f32.partialorder %v186_v29, inf  ;;  %v192_v32 = vand.u32 2147483648, %v186_v29  ;;  %vm191_vm4 = vcmp.eq.f32.partialorder %v186_v29, 0.0 }
 0x1cc   :  { %v285_v30 = vpop.eup %284 }
 0x1cd   :  { %v188_v31 = vmul.f32 %v285_v30, %v186_v29 }
 0x1cf   :  { %v190_v33 = vsel %vm189_vm3, %v186_v29, %v188_v31 }
 0x1d0   :  { %v193_v34 = vsel %vm191_vm4, %v192_v32, %v190_v33 }
 0x1d1   :  { %v194_v36 = vmul.f32 0.47942555, %v193_v34 }
 0x1d3   :  { %v195_v37 = vsub.f32 %v184_v35, %v194_v36 }
 0x1d5   :  { %v196_v38 = vmul.f32 64.0, %v195_v37 }
 0x1d7   :  { %v197_v40 = vsel %vm171_vm2, %v196_v38, %v161_v23  ;;  %v210_v41 = vsel %vm180_vm7, %v196_v38, 0.0 }
 0x1d8   :  { %v199_v42 = vsel %vm198_vm8, %v197_v40, -1e+30  ;;  %v211_v43 = vadd.f32 %v210_v41, %v209_v39 }
 0x1d9   :  { %v239_v44 = vadd.f32 -64.0, %v199_v42 }
 0x1da   :  { %212 = vst.msk [vmem:[#allocation3] sm:$0xff] %vm39_vm1, %v211_v43 }
 0x1db   :  { %v202_v45 = vmul.f32 1.442695, %v239_v44 }
 0x1dd   :  { %286 = vpow2.f32 %v202_v45 }
 0x1e1   :  { %v221_v55 = vld [vmem:[#allocation3] sm:$0xff] }
 0x1e7   :  { %v287_v46 = vpop.eup %286 }
 0x1e8   :  { %204 = vadd.xlane.f32.xlu1 %v287_v46 }
 0x275   :  { %v205_v48 = vpop.xlane.xlu1 %204 }
 0x276   :  { %v206_v49 = vadd.f32 %v205_v48, %v200_v47 }
 0x278   :  { %208 = vst.msk [vmem:[#allocation2] sm:$0xff] %vm39_vm1, %v206_v49 }
 0x27f   :  { %v216_v50 = vld [vmem:[#allocation2] sm:$0xff] }
 0x280   :  { %v217_v51 = vmax.f32 %v216_v50, 1e-37 }
 0x282   :  { %288 = vlog2.f32 %v217_v51 }
 0x28c   :  { %v289_v52 = vpop.eup %288 }
 0x28d   :  { %v219_v53 = vmul.f32 0.6931472, %v289_v52 }
 0x28f   :  { %v220_v54 = vadd.f32 64.0, %v219_v53 }
 0x291   :  { %v222_v56 = vsub.f32 %v220_v54, %v221_v55 }
 0x293   :  { %223 = vst.msk [vmem:[%s389_s5] sm:$0xff] %vm39_vm1, %v222_v56 }
 0x294   :  { %228 = vsyncpa [#allocation5], 1 }

</bundles_post_ra>
